<compile_context>
chip_gen: v7x
topology: tpu7x:2x2x1
jax: 0.10.0
libtpu: 0.0.40
codegen_flags: <defaults>
</compile_context>

<pallas_src>
import functools
import math
from typing import Dict, List, Tuple

import jax
import jax.numpy as jnp
from jax.experimental import pallas as pl
from jax.experimental.pallas import tpu as pltpu

LANE = 128


def _round_up(x: int, m: int) -> int:
    return (x + m - 1) // m * m


def _vmem_capacity_bytes() -> int:
    try:
        info = pltpu.get_tpu_info()
        cap = getattr(info, "vmem_capacity_bytes", None)
        if cap:
            return int(cap)
    except Exception:
        pass
    return 128 << 20   # v5e/v6e default


# ----------------------------------------------------------------------------
# Kernel: combined = x @ W1 + b1 ; out = combined @ W2 + b2   (one batch tile)
# ----------------------------------------------------------------------------
def _multiscale_kernel(x_ref, w1_ref, b1_ref, w2_ref, b2_ref, comb_ref, out_ref):
    # Matmul 1: bf16 x bf16 -> f32 accumulation on the MXU, add f32 bias.
    combined = jnp.dot(x_ref[...], w1_ref[...],
                       preferred_element_type=jnp.float32) + b1_ref[...]
    # Store bf16 combined first so the f32 value can retire before matmul 2
    # (halves the HBM writeback and lowers the VMEM peak).
    comb_ref[...] = combined.astype(comb_ref.dtype)
    # Matmul 2 (fusion): read back the bf16 tile; accumulate in f32.
    out = jnp.dot(comb_ref[...], w2_ref[...],
                  preferred_element_type=jnp.float32) + b2_ref[...]
    out_ref[...] = out.astype(out_ref.dtype)


# ----------------------------------------------------------------------------
# Wrapper
# ----------------------------------------------------------------------------
def multiscale_block_forward(x: jax.Array,
                             params: Dict[str, jax.Array],
                             scales: List[int],
                             out_features: int,
                             *,
                             single_buffer_weights: bool = True
                             ) -> Tuple[jax.Array, Dict[str, jax.Array]]:
    w1 = params["w1"]            # (Fin_p, Ftot_p)  bf16  (segments contiguous, tail-padded)
    b1 = params["b1"]            # (1, Ftot_p)      f32
    w2 = params["w2"]            # (Ftot_p, Fout_p) bf16
    b2 = params["b2"]            # (1, Fout_p)      f32

    B, Fin = x.shape
    Fin_p, Ftot_p = w1.shape
    Fout_p = w2.shape[1]

    vmem_cap = _vmem_capacity_bytes()
    vmem_budget_cap = (vmem_cap * 3) // 4          # leave headroom for Mosaic scratch

    weight_buf_factor = 1 if single_buffer_weights else 2
    weight_bytes = weight_buf_factor * ((Fin_p * Ftot_p + Ftot_p * Fout_p) * 2
                                        + (Ftot_p + Fout_p) * 4)

    def _need_bytes(tb: int) -> int:
        tiles = 2 * tb * (Fin_p * 2 + Ftot_p * 2 + Fout_p * 4)   # double-buffered I/O tiles
        live = tb * (Ftot_p + Fout_p) * 4                        # in-kernel f32 temporaries
        return weight_bytes + tiles + live + (4 << 20)

    # Batch tile selection (generation-aware: 512-row tiles only with >=~96MiB VMEM).
    if B >= 512 and vmem_cap >= (96 << 20):
        tile_b = 512
    elif B >= 256:
        tile_b = 256
    elif B >= 128:
        tile_b = 128
    else:
        tile_b = _round_up(max(B, 1), 16)          # 16 rows: clean bf16 sublane packing
    while tile_b > 16 and _need_bytes(tile_b) > vmem_budget_cap:
        tile_b = max(16, tile_b // 2)
    # TODO(synk): for very large feature dims (weights alone exceeding ~75% VMEM on
    # v7x) add a grid axis over Ftot/Fout with an f32 accumulator + pl.when
    # init/finalize instead of keeping both weights fully resident.

    B_p = _round_up(B, tile_b)
    # Ensure >= 2 grid steps when cheap, so both v7x TensorCores get work.
    if B_p == tile_b and tile_b >= 32 and tile_b % 32 == 0:
        tile_b //= 2
    grid = (B_p // tile_b,)

    # Pad & cast the input once in the wrapper (zero rows/cols are numerically inert).
    x_p = jnp.pad(x.astype(jnp.bfloat16), ((0, B_p - B), (0, Fin_p - Fin)))

    vmem_limit = int(min(max(_need_bytes(tile_b), 16 << 20), vmem_budget_cap))

    flops = 2 * B_p * (Fin_p * Ftot_p + Ftot_p * Fout_p)
    bytes_accessed = (B_p * Fin_p * 2 + w1.size * 2 + w2.size * 2
                      + b1.size * 4 + b2.size * 4
                      + B_p * Ftot_p * 2 + B_p * Fout_p * 4)

    def _resident_spec(shape):
        kwargs = {}
        if single_buffer_weights and hasattr(pl, "Buffered"):
            kwargs["pipeline_mode"] = pl.Buffered(1)   # constant index_map -> 1 buffer
        return pl.BlockSpec(shape, lambda i: (0, 0), **kwargs)

    combined, output = pl.pallas_call(
        _multiscale_kernel,
        out_shape=(
            jax.ShapeDtypeStruct((B_p, Ftot_p), jnp.bfloat16),   # combined in bf16
            jax.ShapeDtypeStruct((B_p, Fout_p), jnp.float32),
        ),
        grid_spec=pltpu.PrefetchScalarGridSpec(
            num_scalar_prefetch=0,
            grid=grid,
            in_specs=[
                pl.BlockSpec((tile_b, Fin_p), lambda i: (i, 0)),   # x tiles over batch
                _resident_spec((Fin_p, Ftot_p)),                   # W1 resident
                _resident_spec((1, Ftot_p)),                       # b1 resident
                _resident_spec((Ftot_p, Fout_p)),                  # W2 resident
                _resident_spec((1, Fout_p)),                       # b2 resident
            ],
            out_specs=(
                pl.BlockSpec((tile_b, Ftot_p), lambda i: (i, 0)),
                pl.BlockSpec((tile_b, Fout_p), lambda i: (i, 0)),
            ),
        ),
        compiler_params=pltpu.CompilerParams(
            dimension_semantics=("parallel",),
            vmem_limit_bytes=vmem_limit,
        ),
        cost_estimate=pl.CostEstimate(
            flops=int(flops), transcendentals=0, bytes_accessed=int(bytes_accessed)),
    )(x_p, w1, b1, w2, b2)

    # Glue (plain XLA): strip padding, recover per-scale outputs from contiguous
    # (unaligned) offsets inside `combined`, cast back to f32 to match the module.
    output = output[:B, :out_features]
    scale_outputs = {}
    off = 0
    for s in scales:
        n = out_features // s
        scale_outputs[f"scale_{s}"] = combined[:B, off:off + n].astype(jnp.float32)
        off += n
    return output, scale_outputs


# ----------------------------------------------------------------------------
# Deterministic parameter construction (mirrors nn.Linear default init + mask),
# laid out pre-transposed / tail-padded as the kernel expects.
# ----------------------------------------------------------------------------
def init_params(key, in_features: int, out_features: int,
                scales: List[int], sparsity: float) -> Dict[str, jax.Array]:
    Fin_p = _round_up(in_features, LANE)
    seg_sizes = [out_features // s for s in scales]
    Ftot = sum(seg_sizes)
    Ftot_p = _round_up(Ftot, LANE)       # single pad of the TOTAL width only
    Fout_p = _round_up(out_features, LANE)

    keys = jax.random.split(key, 3 * len(scales) + 2)
    ki = iter(keys)

    w1 = jnp.zeros((Fin_p, Ftot_p), jnp.float32)
    b1 = jnp.zeros((1, Ftot_p), jnp.float32)
    bound = 1.0 / math.sqrt(in_features)
    off = 0
    for n in seg_sizes:
        w = jax.random.uniform(next(ki), (n, in_features),
                               minval=-bound, maxval=bound, dtype=jnp.float32)
        b = jax.random.uniform(next(ki), (n,),
                               minval=-bound, maxval=bound, dtype=jnp.float32)
        # SparseLayer: binary mask with ~(1 - sparsity) active connections.
        mask = (jax.random.uniform(next(ki), (n, in_features))
                > sparsity).astype(jnp.float32)
        w1 = w1.at[:in_features, off:off + n].set((w * mask).T)
        b1 = b1.at[0, off:off + n].set(b)
        off += n

    bound_f = 1.0 / math.sqrt(Ftot)
    wf = jax.random.uniform(next(ki), (out_features, Ftot),
                            minval=-bound_f, maxval=bound_f, dtype=jnp.float32)
    bf = jax.random.uniform(next(ki), (out_features,),
                            minval=-bound_f, maxval=bound_f, dtype=jnp.float32)

    # Fusion weight: padded rows of W2 stay zero (matching padded columns of
    # `combined` are exactly zero too, so they contribute nothing).
    w2 = jnp.zeros((Ftot_p, Fout_p), jnp.float32)
    b2 = jnp.zeros((1, Fout_p), jnp.float32)
    w2 = w2.at[:Ftot, :out_features].set(wf.T)
    b2 = b2.at[0, :out_features].set(bf)

    return {"w1": w1.astype(jnp.bfloat16), "b1": b1,
            "w2": w2.astype(jnp.bfloat16), "b2": b2}


# ----------------------------------------------------------------------------
# Pure-JAX reference mirroring the kernel arithmetic (bf16 operands, f32 accum,
# bf16 round-trip of `combined` before the fusion matmul).
# ----------------------------------------------------------------------------
def _reference(x, params, scales, out_features):
    Fin_p = params["w1"].shape[0]
    x_p = jnp.pad(x, ((0, 0), (0, Fin_p - x.shape[1]))).astype(jnp.bfloat16)
    combined = jnp.dot(x_p.astype(jnp.float32), params["w1"].astype(jnp.float32),
                       precision=jax.lax.Precision.HIGHEST) + params["b1"]
    comb_bf16 = combined.astype(jnp.bfloat16)
    out = jnp.dot(comb_bf16.astype(jnp.float32), params["w2"].astype(jnp.float32),
                  precision=jax.lax.Precision.HIGHEST) + params["b2"]
    ref_scale = {}
    off = 0
    for s in scales:
        n = out_features // s
        ref_scale[f"scale_{s}"] = comb_bf16[:, off:off + n].astype(jnp.float32)
        off += n
    return out[:, :out_features], ref_scale


if __name__ == "__main__":
    batch = 8
    in_features = 64
    out_features = 64
    scales = [1, 2, 4]          # per-scale outs: 64, 32, 16  -> Ftot = 112
    sparsity = 0.9

    key = jax.random.PRNGKey(0)
    k_x, k_p = jax.random.split(key)
    x = jax.random.normal(k_x, (batch, in_features), dtype=jnp.float32)
    params = init_params(k_p, in_features, out_features, scales, sparsity)

    try:
        fwd = jax.jit(functools.partial(multiscale_block_forward,
                                        scales=scales, out_features=out_features,
                                        single_buffer_weights=True))
        output, scale_outputs = fwd(x, params)
        jax.block_until_ready((output, scale_outputs))
    except Exception:
        # Fallback if this JAX version rejects pipeline_mode=pl.Buffered(1).
        fwd = jax.jit(functools.partial(multiscale_block_forward,
                                        scales=scales, out_features=out_features,
                                        single_buffer_weights=False))
        output, scale_outputs = fwd(x, params)
        jax.block_until_ready((output, scale_outputs))

    # Correctness check against a plain-JAX reference with matching rounding.
    ref_out, ref_scale = _reference(x, params, scales, out_features)
    assert output.shape == (batch, out_features)
    assert jnp.allclose(output, ref_out, atol=5e-3, rtol=5e-3)
    for s in scales:
        n = out_features // s
        assert scale_outputs[f"scale_{s}"].shape == (batch, n)
        assert jnp.allclose(scale_outputs[f"scale_{s}"],
                            ref_scale[f"scale_{s}"], atol=5e-3, rtol=5e-3)

    print("KERNEL_OK")
</pallas_src>

<mosaic_0001>
module attributes {stable_mosaic.version = 11 : i64} {
  func.func @_multiscale_kernel(%arg0: i32, %arg1: memref<16x128xbf16, #tpu.memory_space<vmem>>, %arg2: memref<128x128xbf16, #tpu.memory_space<vmem>>, %arg3: memref<1x128xf32, #tpu.memory_space<vmem>>, %arg4: memref<128x128xbf16, #tpu.memory_space<vmem>>, %arg5: memref<1x128xf32, #tpu.memory_space<vmem>>, %arg6: memref<16x128xbf16, #tpu.memory_space<vmem>>, %arg7: memref<16x128xf32, #tpu.memory_space<vmem>>) attributes {dimension_semantics = [#tpu.dimension_semantics<parallel>], iteration_bounds = array<i64: 1>, scalar_prefetch = 0 : i64, scratch_operands = 0 : i64, tpu.core_type = #tpu.core_type<tc>, window_params = [{transform_indices = @transform_0, window_bounds = array<i64: 16, 128>}, {pipeline_mode = #tpu.pipeline_mode<synchronous>, transform_indices = @transform_1, window_bounds = array<i64: 128, 128>}, {pipeline_mode = #tpu.pipeline_mode<synchronous>, transform_indices = @transform_2, window_bounds = array<i64: 1, 128>}, {pipeline_mode = #tpu.pipeline_mode<synchronous>, transform_indices = @transform_3, window_bounds = array<i64: 128, 128>}, {pipeline_mode = #tpu.pipeline_mode<synchronous>, transform_indices = @transform_4, window_bounds = array<i64: 1, 128>}, {transform_indices = @transform_5, window_bounds = array<i64: 16, 128>}, {transform_indices = @transform_6, window_bounds = array<i64: 16, 128>}]} {
    %c0 = arith.constant 0 : index
    %c0_0 = arith.constant 0 : index
    %0 = vector.load %arg1[%c0, %c0_0] : memref<16x128xbf16, #tpu.memory_space<vmem>>, vector<16x128xbf16>
    %c0_1 = arith.constant 0 : index
    %c0_2 = arith.constant 0 : index
    %1 = vector.load %arg2[%c0_1, %c0_2] : memref<128x128xbf16, #tpu.memory_space<vmem>>, vector<128x128xbf16>
    %cst = arith.constant dense<0.000000e+00> : vector<16x128xf32>
    %2 = tpu.matmul %0, %1, %cst {dimension_numbers = #tpu.dot_dimension_numbers<[1], [0], [0], [1], [0, 0, 1, 1], [], []>} : vector<16x128xbf16>, vector<128x128xbf16>, vector<16x128xf32> -> vector<16x128xf32>
    %c0_3 = arith.constant 0 : index
    %c0_4 = arith.constant 0 : index
    %3 = vector.load %arg3[%c0_3, %c0_4] : memref<1x128xf32, #tpu.memory_space<vmem>>, vector<1x128xf32>
    %4 = vector.broadcast %3 : vector<1x128xf32> to vector<16x128xf32>
    %5 = arith.addf %2, %4 : vector<16x128xf32>
    %6 = arith.truncf %5 : vector<16x128xf32> to vector<16x128xbf16>
    %c0_5 = arith.constant 0 : index
    %c0_6 = arith.constant 0 : index
    %7 = vector.load %arg6[%c0_5, %c0_6] : memref<16x128xbf16, #tpu.memory_space<vmem>>, vector<16x128xbf16>
    tpu.vector_store %arg6[%c0_5, %c0_6], %6 {strides = array<i32>} : memref<16x128xbf16, #tpu.memory_space<vmem>>, vector<16x128xbf16>,
    %c0_7 = arith.constant 0 : index
    %c0_8 = arith.constant 0 : index
    %8 = vector.load %arg6[%c0_7, %c0_8] : memref<16x128xbf16, #tpu.memory_space<vmem>>, vector<16x128xbf16>
    %c0_9 = arith.constant 0 : index
    %c0_10 = arith.constant 0 : index
    %9 = vector.load %arg4[%c0_9, %c0_10] : memref<128x128xbf16, #tpu.memory_space<vmem>>, vector<128x128xbf16>
    %cst_11 = arith.constant dense<0.000000e+00> : vector<16x128xf32>
    %10 = tpu.matmul %8, %9, %cst_11 {dimension_numbers = #tpu.dot_dimension_numbers<[1], [0], [0], [1], [0, 0, 1, 1], [], []>} : vector<16x128xbf16>, vector<128x128xbf16>, vector<16x128xf32> -> vector<16x128xf32>
    %c0_12 = arith.constant 0 : index
    %c0_13 = arith.constant 0 : index
    %11 = vector.load %arg5[%c0_12, %c0_13] : memref<1x128xf32, #tpu.memory_space<vmem>>, vector<1x128xf32>
    %12 = vector.broadcast %11 : vector<1x128xf32> to vector<16x128xf32>
    %13 = arith.addf %10, %12 : vector<16x128xf32>
    %c0_14 = arith.constant 0 : index
    %c0_15 = arith.constant 0 : index
    %14 = vector.load %arg7[%c0_14, %c0_15] : memref<16x128xf32, #tpu.memory_space<vmem>>, vector<16x128xf32>
    tpu.vector_store %arg7[%c0_14, %c0_15], %13 {strides = array<i32>} : memref<16x128xf32, #tpu.memory_space<vmem>>, vector<16x128xf32>,
    return
  }
  func.func @transform_0(%arg0: i32) -> (i32, i32) {
    %c0_i32 = arith.constant 0 : i32
    %c0_i32_0 = arith.constant 0 : i32
    return %arg0, %c0_i32 : i32, i32
  }
  func.func @transform_1(%arg0: i32) -> (i32, i32) {
    %c0_i32 = arith.constant 0 : i32
    %c0_i32_0 = arith.constant 0 : i32
    %c0_i32_1 = arith.constant 0 : i32
    return %c0_i32, %c0_i32_0 : i32, i32
  }
  func.func @transform_2(%arg0: i32) -> (i32, i32) {
    %c0_i32 = arith.constant 0 : i32
    %c0_i32_0 = arith.constant 0 : i32
    %c0_i32_1 = arith.constant 0 : i32
    return %c0_i32, %c0_i32_0 : i32, i32
  }
  func.func @transform_3(%arg0: i32) -> (i32, i32) {
    %c0_i32 = arith.constant 0 : i32
    %c0_i32_0 = arith.constant 0 : i32
    %c0_i32_1 = arith.constant 0 : i32
    return %c0_i32, %c0_i32_0 : i32, i32
  }
  func.func @transform_4(%arg0: i32) -> (i32, i32) {
    %c0_i32 = arith.constant 0 : i32
    %c0_i32_0 = arith.constant 0 : i32
    %c0_i32_1 = arith.constant 0 : i32
    return %c0_i32, %c0_i32_0 : i32, i32
  }
  func.func @transform_5(%arg0: i32) -> (i32, i32) {
    %c0_i32 = arith.constant 0 : i32
    %c0_i32_0 = arith.constant 0 : i32
    return %arg0, %c0_i32 : i32, i32
  }
  func.func @transform_6(%arg0: i32) -> (i32, i32) {
    %c0_i32 = arith.constant 0 : i32
    %c0_i32_0 = arith.constant 0 : i32
    return %arg0, %c0_i32 : i32, i32
  }
}

module attributes {stable_mosaic.version = 11 : i64} {
  func.func @_multiscale_kernel(%arg0: i32, %arg1: memref<16x128xbf16, #tpu.memory_space<vmem>>, %arg2: memref<128x128xbf16, #tpu.memory_space<vmem>>, %arg3: memref<1x128xf32, #tpu.memory_space<vmem>>, %arg4: memref<128x128xbf16, #tpu.memory_space<vmem>>, %arg5: memref<1x128xf32, #tpu.memory_space<vmem>>, %arg6: memref<16x128xbf16, #tpu.memory_space<vmem>>, %arg7: memref<16x128xf32, #tpu.memory_space<vmem>>) attributes {dimension_semantics = [#tpu.dimension_semantics<parallel>], iteration_bounds = array<i64: 1>, scalar_prefetch = 0 : i64, scratch_operands = 0 : i64, tpu.core_type = #tpu.core_type<tc>, window_params = [{transform_indices = @transform_0, window_bounds = array<i64: 16, 128>}, {pipeline_mode = #tpu.pipeline_mode<synchronous>, transform_indices = @transform_1, window_bounds = array<i64: 128, 128>}, {pipeline_mode = #tpu.pipeline_mode<synchronous>, transform_indices = @transform_2, window_bounds = array<i64: 1, 128>}, {pipeline_mode = #tpu.pipeline_mode<synchronous>, transform_indices = @transform_3, window_bounds = array<i64: 128, 128>}, {pipeline_mode = #tpu.pipeline_mode<synchronous>, transform_indices = @transform_4, window_bounds = array<i64: 1, 128>}, {transform_indices = @transform_5, window_bounds = array<i64: 16, 128>}, {transform_indices = @transform_6, window_bounds = array<i64: 16, 128>}]} {
    %c0 = arith.constant 0 : index
    %c0_0 = arith.constant 0 : index
    %0 = vector.load %arg1[%c0, %c0_0] : memref<16x128xbf16, #tpu.memory_space<vmem>>, vector<16x128xbf16>
    %c0_1 = arith.constant 0 : index
    %c0_2 = arith.constant 0 : index
    %1 = vector.load %arg2[%c0_1, %c0_2] : memref<128x128xbf16, #tpu.memory_space<vmem>>, vector<128x128xbf16>
    %cst = arith.constant dense<0.000000e+00> : vector<16x128xf32>
    %2 = tpu.matmul %0, %1, %cst {dimension_numbers = #tpu.dot_dimension_numbers<[1], [0], [0], [1], [0, 0, 1, 1], [], []>} : vector<16x128xbf16>, vector<128x128xbf16>, vector<16x128xf32> -> vector<16x128xf32>
    %c0_3 = arith.constant 0 : index
    %c0_4 = arith.constant 0 : index
    %3 = vector.load %arg3[%c0_3, %c0_4] : memref<1x128xf32, #tpu.memory_space<vmem>>, vector<1x128xf32>
    %4 = vector.broadcast %3 : vector<1x128xf32> to vector<16x128xf32>
    %5 = arith.addf %2, %4 : vector<16x128xf32>
    %6 = arith.truncf %5 : vector<16x128xf32> to vector<16x128xbf16>
    %c0_5 = arith.constant 0 : index
    %c0_6 = arith.constant 0 : index
    %7 = vector.load %arg6[%c0_5, %c0_6] : memref<16x128xbf16, #tpu.memory_space<vmem>>, vector<16x128xbf16>
    tpu.vector_store %arg6[%c0_5, %c0_6], %6 {strides = array<i32>} : memref<16x128xbf16, #tpu.memory_space<vmem>>, vector<16x128xbf16>,
    %c0_7 = arith.constant 0 : index
    %c0_8 = arith.constant 0 : index
    %8 = vector.load %arg6[%c0_7, %c0_8] : memref<16x128xbf16, #tpu.memory_space<vmem>>, vector<16x128xbf16>
    %c0_9 = arith.constant 0 : index
    %c0_10 = arith.constant 0 : index
    %9 = vector.load %arg4[%c0_9, %c0_10] : memref<128x128xbf16, #tpu.memory_space<vmem>>, vector<128x128xbf16>
    %cst_11 = arith.constant dense<0.000000e+00> : vector<16x128xf32>
    %10 = tpu.matmul %8, %9, %cst_11 {dimension_numbers = #tpu.dot_dimension_numbers<[1], [0], [0], [1], [0, 0, 1, 1], [], []>} : vector<16x128xbf16>, vector<128x128xbf16>, vector<16x128xf32> -> vector<16x128xf32>
    %c0_12 = arith.constant 0 : index
    %c0_13 = arith.constant 0 : index
    %11 = vector.load %arg5[%c0_12, %c0_13] : memref<1x128xf32, #tpu.memory_space<vmem>>, vector<1x128xf32>
    %12 = vector.broadcast %11 : vector<1x128xf32> to vector<16x128xf32>
    %13 = arith.addf %10, %12 : vector<16x128xf32>
    %c0_14 = arith.constant 0 : index
    %c0_15 = arith.constant 0 : index
    %14 = vector.load %arg7[%c0_14, %c0_15] : memref<16x128xf32, #tpu.memory_space<vmem>>, vector<16x128xf32>
    tpu.vector_store %arg7[%c0_14, %c0_15], %13 {strides = array<i32>} : memref<16x128xf32, #tpu.memory_space<vmem>>, vector<16x128xf32>,
    return
  }
  func.func @transform_0(%arg0: i32) -> (i32, i32) {
    %c0_i32 = arith.constant 0 : i32
    %c0_i32_0 = arith.constant 0 : i32
    return %arg0, %c0_i32 : i32, i32
  }
  func.func @transform_1(%arg0: i32) -> (i32, i32) {
    %c0_i32 = arith.constant 0 : i32
    %c0_i32_0 = arith.constant 0 : i32
    %c0_i32_1 = arith.constant 0 : i32
    return %c0_i32, %c0_i32_0 : i32, i32
  }
  func.func @transform_2(%arg0: i32) -> (i32, i32) {
    %c0_i32 = arith.constant 0 : i32
    %c0_i32_0 = arith.constant 0 : i32
    %c0_i32_1 = arith.constant 0 : i32
    return %c0_i32, %c0_i32_0 : i32, i32
  }
  func.func @transform_3(%arg0: i32) -> (i32, i32) {
    %c0_i32 = arith.constant 0 : i32
    %c0_i32_0 = arith.constant 0 : i32
    %c0_i32_1 = arith.constant 0 : i32
    return %c0_i32, %c0_i32_0 : i32, i32
  }
  func.func @transform_4(%arg0: i32) -> (i32, i32) {
    %c0_i32 = arith.constant 0 : i32
    %c0_i32_0 = arith.constant 0 : i32
    %c0_i32_1 = arith.constant 0 : i32
    return %c0_i32, %c0_i32_0 : i32, i32
  }
  func.func @transform_5(%arg0: i32) -> (i32, i32) {
    %c0_i32 = arith.constant 0 : i32
    %c0_i32_0 = arith.constant 0 : i32
    return %arg0, %c0_i32 : i32, i32
  }
  func.func @transform_6(%arg0: i32) -> (i32, i32) {
    %c0_i32 = arith.constant 0 : i32
    %c0_i32_0 = arith.constant 0 : i32
    return %arg0, %c0_i32 : i32, i32
  }
}

</mosaic_0001>

<bundles_post_ra>
// kernel: multiscale_block_forward.1
= control target key start
LH: loop header
LB: loop body
LE: loop exit
PB: predicated region body
PF: predicated region fallthrough
CT: control target
= control target key end

     0   :  { %12 = vsyncpa [#allocation3], 0  ;;  %s558_s0 = inlined_call_operand.vmem [shape: bf16[16,128], index: 0, kind: input, shape index: {}]   ;;  %s559_s1 = inlined_call_operand.hbm [shape: bf16[128,128], index: 1, kind: input, shape index: {}]   ;;  %s560_s2 = inlined_call_operand.vmem [shape: f32[1,128], index: 2, kind: input, shape index: {}]   ;;  %s561_s3 = inlined_call_operand.hbm [shape: bf16[128,128], index: 3, kind: input, shape index: {}]   ;;  %s562_s4 = inlined_call_operand.vmem [shape: f32[1,128], index: 4, kind: input, shape index: {}]   ;;  %s563_s5 = inlined_call_operand.vmem [shape: bf16[16,128], index: 5, kind: output, shape index: {0}]   ;;  %s564_s6 = inlined_call_operand.vmem [shape: f32[16,128], index: 6, kind: output, shape index: {1}]  }
   0x1   :  { %13 = vsyncpa [#allocation5], 0  ;;  %s472_s21 = smov [#allocation2]   ;;  %s424_s25 = scalar_lea.hbm %s559_s1, 1024 }
   0x2   :  { %s21_s22 = sshll.u32 %s472_s21, 4  ;;  %p425_p0 = scmp.ne.s32.totalorder %s559_s1, %s424_s25  ;;  %s22_s22 = int_to_ptr.vmem [resolvable:$true] %s21_s22 }
   0x3   :  { %p428_p1 = scmp.lt.u32.totalorder %s424_s25, %s559_s1 }
   0x5   :  { %p430_p2 = pnand %p428_p1, %p425_p0 }
   0x7   :  { %433 = shalt.err (!%p430_p2)
}
   0x8   :  { %s434_s30 = scalar_lea.vmem %s22_s22, 1024  ;;  %p439_p4 = scmp.lt.s32.totalorder %s22_s22, %s22_s22 }
   0x9   :  { %p435_p3 = scmp.ne.s32.totalorder %s22_s22, %s434_s30  ;;  %p440_p5 = scmp.lt.s32.totalorder %s434_s30, %s434_s30 }
   0xb   :  { %p441_p6 = por %p440_p5, %p439_p4 }
   0xd   :  { %p442_p7 = pnand %p441_p6, %p435_p3 }
   0xf   :  { %445 = shalt.err (!%p442_p7)
}
  0x10   :  { %s473_s7 = smov 64   ;;  %s474_s8 = smov 4  }
  0x11   :  { %27 = dma.hbm_to_vmem [thread:$0]  %s559_s1, 1024, %s22_s22, [#allocation3], %s473_s7, %s473_s7, %s474_s8  }
  0x12   :  { %s475_s11 = smov [#allocation4]   ;;  %s446_s15 = scalar_lea.hbm %s561_s3, 1024 }
  0x13   :  { %s35_s12 = sshll.u32 %s475_s11, 4  ;;  %p447_p8 = scmp.ne.s32.totalorder %s561_s3, %s446_s15  ;;  %s36_s12 = int_to_ptr.vmem [resolvable:$true] %s35_s12 }
  0x14   :  { %p450_p9 = scmp.lt.u32.totalorder %s446_s15, %s561_s3 }
  0x16   :  { %p452_p10 = pnand %p450_p9, %p447_p8 }
  0x18   :  { %455 = shalt.err (!%p452_p10)
}
  0x19   :  { %s456_s20 = scalar_lea.vmem %s36_s12, 1024  ;;  %p461_p12 = scmp.lt.s32.totalorder %s36_s12, %s36_s12 }
  0x1a   :  { %p457_p11 = scmp.ne.s32.totalorder %s36_s12, %s456_s20  ;;  %p462_p13 = scmp.lt.s32.totalorder %s456_s20, %s456_s20 }
  0x1c   :  { %p463_p0 = por %p462_p13, %p461_p12 }
  0x1e   :  { %p464_p1 = pnand %p463_p0, %p457_p11 }
  0x20   :  { %467 = shalt.err (!%p464_p1)
}
  0x21   :  { %41 = dma.hbm_to_vmem [thread:$0]  %s561_s3, 1024, %s36_s12, [#allocation5], %s473_s7, %s473_s7, %s474_s8  }
  0x22   :  { %468 = dma.done.wait [#allocation3], 1024  }
  0x23   :  { %469 = vsyncadd [#allocation3], 4294966272 }
  0x24   :  { %470 = dma.done.wait [#allocation5], 1024  }
  0x25   :  { %471 = vsyncadd [#allocation5], 4294966272  ;;  %v476_v0 = vmov 0.0   ;;  %vm477_vm0 = vmmov 0   ;;  %v406_v1 = vld [vmem:[#allocation2] sm:$0xff]   ;;  %v407_v2 = vld [vmem:[#allocation2 + $0x8] sm:$0xff]  }
  0x26   :  { %360 = vmatprep.subr.bf16.mxu0 %v476_v0  ;;  %376 = vmatprep.mubr.msk.bf16.mxu0 %vm477_vm0, %v476_v0  ;;  %v408_v3 = vld [vmem:[#allocation2 + $0x10] sm:$0xff]   ;;  %v415_v4 = vld [vmem:[#allocation4] sm:$0xff]   ;;  %v409_v5 = vld [vmem:[#allocation2 + $0x18] sm:$0xff]  }
  0x27   :  { %380 = vmatprep.subr.bf16.mxu1 %v476_v0  ;;  %396 = vmatprep.mubr.msk.bf16.mxu1 %vm477_vm0, %v476_v0  ;;  %v416_v6 = vld [vmem:[#allocation4 + $0x8] sm:$0xff]   ;;  %v410_v7 = vld [vmem:[#allocation2 + $0x20] sm:$0xff]   ;;  %v417_v8 = vld [vmem:[#allocation4 + $0x10] sm:$0xff]  }
  0x28   :  { %361 = vmatpush3.bf16.msra.mxu0 %v406_v1  ;;  %381 = vmatpush3.bf16.msra.mxu1 %v415_v4  ;;  %v411_v9 = vld [vmem:[#allocation2 + $0x28] sm:$0xff]   ;;  %v418_v10 = vld [vmem:[#allocation4 + $0x18] sm:$0xff]   ;;  %v412_v11 = vld [vmem:[#allocation2 + $0x30] sm:$0xff]  }
  0x29   :  { %362 = vmatprep.subr.bf16.mxu0 %v476_v0  ;;  %382 = vmatprep.subr.bf16.mxu1 %v476_v0  ;;  %v413_v12 = vld [vmem:[#allocation2 + $0x38] sm:$0xff]   ;;  %v414_v13 = vld [vmem:[%s558_s0] sm:$0xff]   ;;  %v420_v15 = vld [vmem:[#allocation4 + $0x28] sm:$0xff]  }
  0x2a   :  { %v419_v14 = vld [vmem:[#allocation4 + $0x20] sm:$0xff]   ;;  %v421_v16 = vld [vmem:[#allocation4 + $0x30] sm:$0xff]   ;;  %v422_v17 = vld [vmem:[#allocation4 + $0x38] sm:$0xff]  }
  0x2b   :  { %v313_v18 = vld [vmem:[%s560_s2] ss:$0 sm:$0xff] }
  0x2c   :  { %363 = vmatpush3.bf16.msra.mxu0 %v407_v2  ;;  %383 = vmatpush3.bf16.msra.mxu1 %v416_v6  ;;  %v325_v27 = vld [vmem:[%s562_s4] ss:$0 sm:$0xff] }
  0x2d   :  { %364 = vmatprep.subr.bf16.mxu0 %v476_v0  ;;  %384 = vmatprep.subr.bf16.mxu1 %v476_v0 }
  0x30   :  { %365 = vmatpush3.bf16.msra.mxu0 %v408_v3  ;;  %385 = vmatpush3.bf16.msra.mxu1 %v417_v8 }
  0x31   :  { %366 = vmatprep.subr.bf16.mxu0 %v476_v0  ;;  %386 = vmatprep.subr.bf16.mxu1 %v476_v0 }
  0x34   :  { %367 = vmatpush3.bf16.msra.mxu0 %v409_v5  ;;  %387 = vmatpush3.bf16.msra.mxu1 %v418_v10 }
  0x35   :  { %368 = vmatprep.subr.bf16.mxu0 %v476_v0  ;;  %388 = vmatprep.subr.bf16.mxu1 %v476_v0 }
  0x38   :  { %369 = vmatpush3.bf16.msra.mxu0 %v410_v7  ;;  %389 = vmatpush3.bf16.msra.mxu1 %v419_v14 }
  0x39   :  { %370 = vmatprep.subr.bf16.mxu0 %v476_v0  ;;  %390 = vmatprep.subr.bf16.mxu1 %v476_v0 }
  0x3c   :  { %371 = vmatpush3.bf16.msra.mxu0 %v411_v9  ;;  %391 = vmatpush3.bf16.msra.mxu1 %v420_v15 }
  0x3d   :  { %372 = vmatprep.subr.bf16.mxu0 %v476_v0  ;;  %392 = vmatprep.subr.bf16.mxu1 %v476_v0 }
  0x40   :  { %373 = vmatpush3.bf16.msra.mxu0 %v412_v11  ;;  %393 = vmatpush3.bf16.msra.mxu1 %v421_v16 }
  0x41   :  { %374 = vmatprep.subr.bf16.mxu0 %v476_v0  ;;  %394 = vmatprep.subr.bf16.mxu1 %v476_v0 }
  0x44   :  { %375 = vmatpush3.bf16.msra.mxu0 %v413_v12  ;;  %395 = vmatpush3.bf16.msra.mxu1 %v422_v17 }
  0x47   :  { %377 = vmatmul.mubr.bf16.vlgmr.msra.gmra.mrb[0].mxu0 %v414_v13 }
 0x11a   :  { %v164_v19 = vpop.f32.mrb[0].mxu0 }
 0x11b   :  { %v378_v20 = vpop.f32.mrb[1].mxu0  ;;  %v165_v22 = vadd.f32 %v313_v18, %v164_v19 }
 0x11c   :  { %v167_v21 = vpop.f32.mrb[2].mxu0 }
 0x11d   :  { %v168_v23 = vadd.f32 %v313_v18, %v167_v21  ;;  %v379_v24 = vpop.f32.mrb[3].mxu0 }
 0x11f   :  { %v340_v25 = vpack.c.bf16 %v168_v23, %v165_v22 }
 0x121   :  { %341 = vst [vmem:[%s563_s5] sm:$0xff] %v340_v25  }
 0x128   :  { %v423_v26 = vld [vmem:[%s563_s5] sm:$0xff]  }
 0x129   :  { %397 = vmatmul.mubr.bf16.vlgmr.msra.gmra.mrb[0].mxu1 %v423_v26 }
 0x1fc   :  { %v294_v28 = vpop.f32.mrb[0].mxu1 }
 0x1fd   :  { %v295_v29 = vadd.f32 %v325_v27, %v294_v28  ;;  %v398_v30 = vpop.f32.mrb[1].mxu1 }
 0x1fe   :  { %v297_v31 = vpop.f32.mrb[2].mxu1 }
 0x1ff   :  { %301 = vst [vmem:[%s564_s6] sm:$0xff] %v295_v29  ;;  %v298_v32 = vadd.f32 %v325_v27, %v297_v31  ;;  %v399_v33 = vpop.f32.mrb[3].mxu1 }
 0x201   :  { %302 = vst [vmem:[%s564_s6 + $0x8] sm:$0xff] %v298_v32 }
 0x202   :  { %311 = vsyncpa [#allocation3], 1 }
 0x203   :  { %312 = vsyncpa [#allocation5], 1 }

// kernel: multiscale_block_forward.1
= control target key start
LH: loop header
LB: loop body
LE: loop exit
PB: predicated region body
PF: predicated region fallthrough
CT: control target
= control target key end

     0   :  { %12 = vsyncpa [#allocation3], 0  ;;  %s558_s0 = inlined_call_operand.vmem [shape: bf16[16,128], index: 0, kind: input, shape index: {}]   ;;  %s559_s1 = inlined_call_operand.hbm [shape: bf16[128,128], index: 1, kind: input, shape index: {}]   ;;  %s560_s2 = inlined_call_operand.vmem [shape: f32[1,128], index: 2, kind: input, shape index: {}]   ;;  %s561_s3 = inlined_call_operand.hbm [shape: bf16[128,128], index: 3, kind: input, shape index: {}]   ;;  %s562_s4 = inlined_call_operand.vmem [shape: f32[1,128], index: 4, kind: input, shape index: {}]   ;;  %s563_s5 = inlined_call_operand.vmem [shape: bf16[16,128], index: 5, kind: output, shape index: {0}]   ;;  %s564_s6 = inlined_call_operand.vmem [shape: f32[16,128], index: 6, kind: output, shape index: {1}]  }
   0x1   :  { %13 = vsyncpa [#allocation5], 0  ;;  %s472_s21 = smov [#allocation2]   ;;  %s424_s25 = scalar_lea.hbm %s559_s1, 1024 }
   0x2   :  { %s21_s22 = sshll.u32 %s472_s21, 4  ;;  %p425_p0 = scmp.ne.s32.totalorder %s559_s1, %s424_s25  ;;  %s22_s22 = int_to_ptr.vmem [resolvable:$true] %s21_s22 }
   0x3   :  { %p428_p1 = scmp.lt.u32.totalorder %s424_s25, %s559_s1 }
   0x5   :  { %p430_p2 = pnand %p428_p1, %p425_p0 }
   0x7   :  { %433 = shalt.err (!%p430_p2)
}
   0x8   :  { %s434_s30 = scalar_lea.vmem %s22_s22, 1024  ;;  %p439_p4 = scmp.lt.s32.totalorder %s22_s22, %s22_s22 }
   0x9   :  { %p435_p3 = scmp.ne.s32.totalorder %s22_s22, %s434_s30  ;;  %p440_p5 = scmp.lt.s32.totalorder %s434_s30, %s434_s30 }
   0xb   :  { %p441_p6 = por %p440_p5, %p439_p4 }
   0xd   :  { %p442_p7 = pnand %p441_p6, %p435_p3 }
   0xf   :  { %445 = shalt.err (!%p442_p7)
}
  0x10   :  { %s473_s7 = smov 64   ;;  %s474_s8 = smov 4  }
  0x11   :  { %27 = dma.hbm_to_vmem [thread:$0]  %s559_s1, 1024, %s22_s22, [#allocation3], %s473_s7, %s473_s7, %s474_s8  }
  0x12   :  { %s475_s11 = smov [#allocation4]   ;;  %s446_s15 = scalar_lea.hbm %s561_s3, 1024 }
  0x13   :  { %s35_s12 = sshll.u32 %s475_s11, 4  ;;  %p447_p8 = scmp.ne.s32.totalorder %s561_s3, %s446_s15  ;;  %s36_s12 = int_to_ptr.vmem [resolvable:$true] %s35_s12 }
  0x14   :  { %p450_p9 = scmp.lt.u32.totalorder %s446_s15, %s561_s3 }
  0x16   :  { %p452_p10 = pnand %p450_p9, %p447_p8 }
  0x18   :  { %455 = shalt.err (!%p452_p10)
}
  0x19   :  { %s456_s20 = scalar_lea.vmem %s36_s12, 1024  ;;  %p461_p12 = scmp.lt.s32.totalorder %s36_s12, %s36_s12 }
  0x1a   :  { %p457_p11 = scmp.ne.s32.totalorder %s36_s12, %s456_s20  ;;  %p462_p13 = scmp.lt.s32.totalorder %s456_s20, %s456_s20 }
  0x1c   :  { %p463_p0 = por %p462_p13, %p461_p12 }
  0x1e   :  { %p464_p1 = pnand %p463_p0, %p457_p11 }
  0x20   :  { %467 = shalt.err (!%p464_p1)
}
  0x21   :  { %41 = dma.hbm_to_vmem [thread:$0]  %s561_s3, 1024, %s36_s12, [#allocation5], %s473_s7, %s473_s7, %s474_s8  }
  0x22   :  { %468 = dma.done.wait [#allocation3], 1024  }
  0x23   :  { %469 = vsyncadd [#allocation3], 4294966272 }
  0x24   :  { %470 = dma.done.wait [#allocation5], 1024  }
  0x25   :  { %471 = vsyncadd [#allocation5], 4294966272  ;;  %v476_v0 = vmov 0.0   ;;  %vm477_vm0 = vmmov 0   ;;  %v406_v1 = vld [vmem:[#allocation2] sm:$0xff]   ;;  %v407_v2 = vld [vmem:[#allocation2 + $0x8] sm:$0xff]  }
  0x26   :  { %360 = vmatprep.subr.bf16.mxu0 %v476_v0  ;;  %376 = vmatprep.mubr.msk.bf16.mxu0 %vm477_vm0, %v476_v0  ;;  %v408_v3 = vld [vmem:[#allocation2 + $0x10] sm:$0xff]   ;;  %v415_v4 = vld [vmem:[#allocation4] sm:$0xff]   ;;  %v409_v5 = vld [vmem:[#allocation2 + $0x18] sm:$0xff]  }
  0x27   :  { %380 = vmatprep.subr.bf16.mxu1 %v476_v0  ;;  %396 = vmatprep.mubr.msk.bf16.mxu1 %vm477_vm0, %v476_v0  ;;  %v416_v6 = vld [vmem:[#allocation4 + $0x8] sm:$0xff]   ;;  %v410_v7 = vld [vmem:[#allocation2 + $0x20] sm:$0xff]   ;;  %v417_v8 = vld [vmem:[#allocation4 + $0x10] sm:$0xff]  }
  0x28   :  { %361 = vmatpush3.bf16.msra.mxu0 %v406_v1  ;;  %381 = vmatpush3.bf16.msra.mxu1 %v415_v4  ;;  %v411_v9 = vld [vmem:[#allocation2 + $0x28] sm:$0xff]   ;;  %v418_v10 = vld [vmem:[#allocation4 + $0x18] sm:$0xff]   ;;  %v412_v11 = vld [vmem:[#allocation2 + $0x30] sm:$0xff]  }
  0x29   :  { %362 = vmatprep.subr.bf16.mxu0 %v476_v0  ;;  %382 = vmatprep.subr.bf16.mxu1 %v476_v0  ;;  %v413_v12 = vld [vmem:[#allocation2 + $0x38] sm:$0xff]   ;;  %v414_v13 = vld [vmem:[%s558_s0] sm:$0xff]   ;;  %v420_v15 = vld [vmem:[#allocation4 + $0x28] sm:$0xff]  }
  0x2a   :  { %v419_v14 = vld [vmem:[#allocation4 + $0x20] sm:$0xff]   ;;  %v421_v16 = vld [vmem:[#allocation4 + $0x30] sm:$0xff]   ;;  %v422_v17 = vld [vmem:[#allocation4 + $0x38] sm:$0xff]  }
  0x2b   :  { %v313_v18 = vld [vmem:[%s560_s2] ss:$0 sm:$0xff] }
  0x2c   :  { %363 = vmatpush3.bf16.msra.mxu0 %v407_v2  ;;  %383 = vmatpush3.bf16.msra.mxu1 %v416_v6  ;;  %v325_v27 = vld [vmem:[%s562_s4] ss:$0 sm:$0xff] }
  0x2d   :  { %364 = vmatprep.subr.bf16.mxu0 %v476_v0  ;;  %384 = vmatprep.subr.bf16.mxu1 %v476_v0 }
  0x30   :  { %365 = vmatpush3.bf16.msra.mxu0 %v408_v3  ;;  %385 = vmatpush3.bf16.msra.mxu1 %v417_v8 }
  0x31   :  { %366 = vmatprep.subr.bf16.mxu0 %v476_v0  ;;  %386 = vmatprep.subr.bf16.mxu1 %v476_v0 }
  0x34   :  { %367 = vmatpush3.bf16.msra.mxu0 %v409_v5  ;;  %387 = vmatpush3.bf16.msra.mxu1 %v418_v10 }
  0x35   :  { %368 = vmatprep.subr.bf16.mxu0 %v476_v0  ;;  %388 = vmatprep.subr.bf16.mxu1 %v476_v0 }
  0x38   :  { %369 = vmatpush3.bf16.msra.mxu0 %v410_v7  ;;  %389 = vmatpush3.bf16.msra.mxu1 %v419_v14 }
  0x39   :  { %370 = vmatprep.subr.bf16.mxu0 %v476_v0  ;;  %390 = vmatprep.subr.bf16.mxu1 %v476_v0 }
  0x3c   :  { %371 = vmatpush3.bf16.msra.mxu0 %v411_v9  ;;  %391 = vmatpush3.bf16.msra.mxu1 %v420_v15 }
  0x3d   :  { %372 = vmatprep.subr.bf16.mxu0 %v476_v0  ;;  %392 = vmatprep.subr.bf16.mxu1 %v476_v0 }
  0x40   :  { %373 = vmatpush3.bf16.msra.mxu0 %v412_v11  ;;  %393 = vmatpush3.bf16.msra.mxu1 %v421_v16 }
  0x41   :  { %374 = vmatprep.subr.bf16.mxu0 %v476_v0  ;;  %394 = vmatprep.subr.bf16.mxu1 %v476_v0 }
  0x44   :  { %375 = vmatpush3.bf16.msra.mxu0 %v413_v12  ;;  %395 = vmatpush3.bf16.msra.mxu1 %v422_v17 }
  0x47   :  { %377 = vmatmul.mubr.bf16.vlgmr.msra.gmra.mrb[0].mxu0 %v414_v13 }
 0x11a   :  { %v164_v19 = vpop.f32.mrb[0].mxu0 }
 0x11b   :  { %v378_v20 = vpop.f32.mrb[1].mxu0  ;;  %v165_v22 = vadd.f32 %v313_v18, %v164_v19 }
 0x11c   :  { %v167_v21 = vpop.f32.mrb[2].mxu0 }
 0x11d   :  { %v168_v23 = vadd.f32 %v313_v18, %v167_v21  ;;  %v379_v24 = vpop.f32.mrb[3].mxu0 }
 0x11f   :  { %v340_v25 = vpack.c.bf16 %v168_v23, %v165_v22 }
 0x121   :  { %341 = vst [vmem:[%s563_s5] sm:$0xff] %v340_v25  }
 0x128   :  { %v423_v26 = vld [vmem:[%s563_s5] sm:$0xff]  }
 0x129   :  { %397 = vmatmul.mubr.bf16.vlgmr.msra.gmra.mrb[0].mxu1 %v423_v26 }
 0x1fc   :  { %v294_v28 = vpop.f32.mrb[0].mxu1 }
 0x1fd   :  { %v295_v29 = vadd.f32 %v325_v27, %v294_v28  ;;  %v398_v30 = vpop.f32.mrb[1].mxu1 }
 0x1fe   :  { %v297_v31 = vpop.f32.mrb[2].mxu1 }
 0x1ff   :  { %301 = vst [vmem:[%s564_s6] sm:$0xff] %v295_v29  ;;  %v298_v32 = vadd.f32 %v325_v27, %v297_v31  ;;  %v399_v33 = vpop.f32.mrb[3].mxu1 }
 0x201   :  { %302 = vst [vmem:[%s564_s6 + $0x8] sm:$0xff] %v298_v32 }
 0x202   :  { %311 = vsyncpa [#allocation3], 1 }
 0x203   :  { %312 = vsyncpa [#allocation5], 1 }

</bundles_post_ra>
